<compile_context>
chip_gen: v7x
topology: tpu7x:2x2x1
jax: 0.10.0
libtpu: 0.0.40
codegen_flags: <defaults>
</compile_context>

<pallas_src>
import jax
import jax.numpy as jnp
from jax.experimental import pallas as pl
from jax.experimental.pallas import tpu as pltpu

D_IN, H1, H2, H3, D_OUT = 28 * 28, 128, 64, 64, 10
HP = 128          # lane-dense padded width for the 64/10-wide layers
TB_MAX = 1024     # max batch tile (rows); ~1.6 MiB bf16 x-tile, well in VMEM


def _round_up(n, m):
    return ((n + m - 1) // m) * m


def _choose_tb(b):
    """Batch tile size.

    - multiple of 16 (bf16 sublane packing), minimum 16
    - once b >= 512, split into >=2 equal-size blocks so the "parallel" batch
      grid axis shards evenly across both v7x TensorCores (and megacore).
    """
    if b >= 512:
        return min(TB_MAX, _round_up((b + 1) // 2, 16))
    return min(TB_MAX, max(16, _round_up(b, 16)))


def mlp2_kernel(x_ref, w1_ref, b1_ref, w3_ref, b3_ref,
                w4_ref, b4_ref, w5_ref, b5_ref, o_ref):
    bf16, f32 = jnp.bfloat16, jnp.float32
    x = x_ref[...]
    if x.dtype != bf16:          # no-op when the producer already emits bf16
        x = x.astype(bf16)
    # fc1 + ReLU (bf16 MXU, fp32 accumulate; bias/ReLU stay fp32 on the VPU)
    h = jnp.dot(x, w1_ref[...], preferred_element_type=f32)
    h = jnp.maximum(h + b1_ref[...], 0.0)
    # fc3 + ReLU (padded lanes 64..127 stay exactly 0: zero weights/bias)
    h = jnp.dot(h.astype(bf16), w3_ref[...], preferred_element_type=f32)
    h = jnp.maximum(h + b3_ref[...], 0.0)
    # fc4 + ReLU
    h = jnp.dot(h.astype(bf16), w4_ref[...], preferred_element_type=f32)
    h = jnp.maximum(h + b4_ref[...], 0.0)
    # fc5 (no activation); columns 10..127 are zero and sliced off outside
    y = jnp.dot(h.astype(bf16), w5_ref[...], preferred_element_type=f32)
    o_ref[...] = (y + b5_ref[...]).astype(o_ref.dtype)   # bf16 lane-dense store


def prepare_params(params):
    """One-time host-side prep: zero-pad to lane-dense 128 cols, cast W to bf16.

    Invariant: padded weight rows/cols and padded bias lanes are EXACTLY zero.
    """
    w1, b1, w3, b3, w4, b4, w5, b5 = params

    def pad_w(w, rows, cols):
        return jnp.pad(w, ((0, rows - w.shape[0]),
                           (0, cols - w.shape[1]))).astype(jnp.bfloat16)

    def pad_b(bv, cols):
        bv = bv.reshape(1, -1)
        return jnp.pad(bv, ((0, 0), (0, cols - bv.shape[1]))).astype(jnp.float32)

    return (pad_w(w1, D_IN, HP), pad_b(b1, HP),
            pad_w(w3, HP, HP),   pad_b(b3, HP),
            pad_w(w4, HP, HP),   pad_b(b4, HP),
            pad_w(w5, HP, HP),   pad_b(b5, HP))


@jax.jit
def mlp2_forward(x, prepared_params):
    """x: anything that flattens to (-1, 784); ideally already bf16 from the
    producer. Returns (logits[b, 10] (bf16), None) like MLP2.forward."""
    x = x.reshape(-1, D_IN)
    b = x.shape[0]

    tb = _choose_tb(b)
    grid = (pl.cdiv(b, tb),)

    w1, b1, w3, b3, w4, b4, w5, b5 = prepared_params
    full = lambda shape: pl.BlockSpec(shape, lambda i: (0, 0))  # resident weights

    y = pl.pallas_call(
        mlp2_kernel,
        out_shape=jax.ShapeDtypeStruct((b, HP), jnp.bfloat16),
        grid_spec=pltpu.PrefetchScalarGridSpec(
            num_scalar_prefetch=0,
            grid=grid,
            in_specs=[
                pl.BlockSpec((tb, D_IN), lambda i: (i, 0)),   # x tile
                full((D_IN, HP)), full((1, HP)),              # fc1
                full((HP, HP)),   full((1, HP)),              # fc3
                full((HP, HP)),   full((1, HP)),              # fc4
                full((HP, HP)),   full((1, HP)),              # fc5
            ],
            out_specs=pl.BlockSpec((tb, HP), lambda i: (i, 0)),
        ),
        compiler_params=pltpu.CompilerParams(
            dimension_semantics=("parallel",),
            vmem_limit_bytes=32 * 1024 * 1024),
    )(x, w1, b1, w3, b3, w4, b4, w5, b5)

    # Slice out the 10 real logits (bf16; consumers wanting fp32 can cast).
    return y[:, :D_OUT], None


def init_params(key):
    """PyTorch-Linear-style init: U(-1/sqrt(fan_in), 1/sqrt(fan_in)).

    Weights stored as (in_features, out_features); biases as (1, out)."""
    dims = [(D_IN, H1), (H1, H2), (H2, H3), (H3, D_OUT)]
    params = []
    for fan_in, fan_out in dims:
        key, kw, kb = jax.random.split(key, 3)
        bound = 1.0 / jnp.sqrt(fan_in)
        w = jax.random.uniform(kw, (fan_in, fan_out), jnp.float32, -bound, bound)
        bvec = jax.random.uniform(kb, (1, fan_out), jnp.float32, -bound, bound)
        params.extend([w, bvec])
    return tuple(params)


if __name__ == "__main__":
    key = jax.random.PRNGKey(0)
    k_params, k_x = jax.random.split(key)

    params = init_params(k_params)
    prepared = prepare_params(params)

    # Producer emits bf16 directly (no wrapper-side cast / extra HBM pass).
    # Small NCHW-style input consistent with the 28*28 flatten: (B=2, 1, 28, 28).
    x = jax.random.normal(k_x, (2, 1, 28, 28), dtype=jnp.bfloat16)

    # TODO(synk): add_noise=True branch of the custom Linear (log_noise_std)
    # is not modeled; forward uses the default add_noise=False path.
    y, aux = mlp2_forward(x, prepared)
    y = jax.block_until_ready(y)

    # Reference in plain JAX mirroring the kernel math (bf16 operands, fp32
    # accumulation, bf16 final store).
    w1, b1, w3, b3, w4, b4, w5, b5 = params
    bf, f32 = jnp.bfloat16, jnp.float32
    xr = x.reshape(-1, D_IN).astype(bf)
    h = jnp.maximum(jnp.dot(xr, w1.astype(bf), preferred_element_type=f32) + b1, 0.0)
    h = jnp.maximum(jnp.dot(h.astype(bf), w3.astype(bf), preferred_element_type=f32) + b3, 0.0)
    h = jnp.maximum(jnp.dot(h.astype(bf), w4.astype(bf), preferred_element_type=f32) + b4, 0.0)
    y_ref = (jnp.dot(h.astype(bf), w5.astype(bf), preferred_element_type=f32) + b5).astype(bf)

    assert y.shape == (2, D_OUT) and y.dtype == jnp.bfloat16 and aux is None
    y32, y_ref32 = y.astype(f32), y_ref.astype(f32)
    err = float(jnp.max(jnp.abs(y32 - y_ref32)))
    assert jnp.allclose(y32, y_ref32, atol=2e-2, rtol=2e-2), err
    print("KERNEL_OK")
</pallas_src>

<mosaic_0001>
module attributes {stable_mosaic.version = 11 : i64} {
  func.func @mlp2_kernel(%arg0: i32, %arg1: memref<16x784xbf16, #tpu.memory_space<vmem>>, %arg2: memref<784x128xbf16, #tpu.memory_space<vmem>>, %arg3: memref<1x128xf32, #tpu.memory_space<vmem>>, %arg4: memref<128x128xbf16, #tpu.memory_space<vmem>>, %arg5: memref<1x128xf32, #tpu.memory_space<vmem>>, %arg6: memref<128x128xbf16, #tpu.memory_space<vmem>>, %arg7: memref<1x128xf32, #tpu.memory_space<vmem>>, %arg8: memref<128x128xbf16, #tpu.memory_space<vmem>>, %arg9: memref<1x128xf32, #tpu.memory_space<vmem>>, %arg10: memref<16x128xbf16, #tpu.memory_space<vmem>>) attributes {dimension_semantics = [#tpu.dimension_semantics<parallel>], iteration_bounds = array<i64: 1>, scalar_prefetch = 0 : i64, scratch_operands = 0 : i64, tpu.core_type = #tpu.core_type<tc>, window_params = [{transform_indices = @transform_0, window_bounds = array<i64: 16, 784>}, {pipeline_mode = #tpu.pipeline_mode<synchronous>, transform_indices = @transform_1, window_bounds = array<i64: 784, 128>}, {pipeline_mode = #tpu.pipeline_mode<synchronous>, transform_indices = @transform_2, window_bounds = array<i64: 1, 128>}, {pipeline_mode = #tpu.pipeline_mode<synchronous>, transform_indices = @transform_3, window_bounds = array<i64: 128, 128>}, {pipeline_mode = #tpu.pipeline_mode<synchronous>, transform_indices = @transform_4, window_bounds = array<i64: 1, 128>}, {pipeline_mode = #tpu.pipeline_mode<synchronous>, transform_indices = @transform_5, window_bounds = array<i64: 128, 128>}, {pipeline_mode = #tpu.pipeline_mode<synchronous>, transform_indices = @transform_6, window_bounds = array<i64: 1, 128>}, {pipeline_mode = #tpu.pipeline_mode<synchronous>, transform_indices = @transform_7, window_bounds = array<i64: 128, 128>}, {pipeline_mode = #tpu.pipeline_mode<synchronous>, transform_indices = @transform_8, window_bounds = array<i64: 1, 128>}, {transform_indices = @transform_9, window_bounds = array<i64: 16, 128>}]} {
    %c0 = arith.constant 0 : index
    %c0_0 = arith.constant 0 : index
    %0 = vector.load %arg1[%c0, %c0_0] : memref<16x784xbf16, #tpu.memory_space<vmem>>, vector<16x784xbf16>
    %c0_1 = arith.constant 0 : index
    %c0_2 = arith.constant 0 : index
    %1 = vector.load %arg2[%c0_1, %c0_2] : memref<784x128xbf16, #tpu.memory_space<vmem>>, vector<784x128xbf16>
    %cst = arith.constant dense<0.000000e+00> : vector<16x128xf32>
    %2 = tpu.matmul %0, %1, %cst {dimension_numbers = #tpu.dot_dimension_numbers<[1], [0], [0], [1], [0, 0, 1, 1], [], []>} : vector<16x784xbf16>, vector<784x128xbf16>, vector<16x128xf32> -> vector<16x128xf32>
    %c0_3 = arith.constant 0 : index
    %c0_4 = arith.constant 0 : index
    %3 = vector.load %arg3[%c0_3, %c0_4] : memref<1x128xf32, #tpu.memory_space<vmem>>, vector<1x128xf32>
    %4 = vector.broadcast %3 : vector<1x128xf32> to vector<16x128xf32>
    %5 = arith.addf %2, %4 : vector<16x128xf32>
    %cst_5 = arith.constant 0.000000e+00 : f32
    %6 = vector.broadcast %cst_5 : f32 to vector<16x128xf32>
    %7 = arith.maximumf %5, %6 : vector<16x128xf32>
    %8 = arith.truncf %7 : vector<16x128xf32> to vector<16x128xbf16>
    %c0_6 = arith.constant 0 : index
    %c0_7 = arith.constant 0 : index
    %9 = vector.load %arg4[%c0_6, %c0_7] : memref<128x128xbf16, #tpu.memory_space<vmem>>, vector<128x128xbf16>
    %cst_8 = arith.constant dense<0.000000e+00> : vector<16x128xf32>
    %10 = tpu.matmul %8, %9, %cst_8 {dimension_numbers = #tpu.dot_dimension_numbers<[1], [0], [0], [1], [0, 0, 1, 1], [], []>} : vector<16x128xbf16>, vector<128x128xbf16>, vector<16x128xf32> -> vector<16x128xf32>
    %c0_9 = arith.constant 0 : index
    %c0_10 = arith.constant 0 : index
    %11 = vector.load %arg5[%c0_9, %c0_10] : memref<1x128xf32, #tpu.memory_space<vmem>>, vector<1x128xf32>
    %12 = vector.broadcast %11 : vector<1x128xf32> to vector<16x128xf32>
    %13 = arith.addf %10, %12 : vector<16x128xf32>
    %cst_11 = arith.constant 0.000000e+00 : f32
    %14 = vector.broadcast %cst_11 : f32 to vector<16x128xf32>
    %15 = arith.maximumf %13, %14 : vector<16x128xf32>
    %16 = arith.truncf %15 : vector<16x128xf32> to vector<16x128xbf16>
    %c0_12 = arith.constant 0 : index
    %c0_13 = arith.constant 0 : index
    %17 = vector.load %arg6[%c0_12, %c0_13] : memref<128x128xbf16, #tpu.memory_space<vmem>>, vector<128x128xbf16>
    %cst_14 = arith.constant dense<0.000000e+00> : vector<16x128xf32>
    %18 = tpu.matmul %16, %17, %cst_14 {dimension_numbers = #tpu.dot_dimension_numbers<[1], [0], [0], [1], [0, 0, 1, 1], [], []>} : vector<16x128xbf16>, vector<128x128xbf16>, vector<16x128xf32> -> vector<16x128xf32>
    %c0_15 = arith.constant 0 : index
    %c0_16 = arith.constant 0 : index
    %19 = vector.load %arg7[%c0_15, %c0_16] : memref<1x128xf32, #tpu.memory_space<vmem>>, vector<1x128xf32>
    %20 = vector.broadcast %19 : vector<1x128xf32> to vector<16x128xf32>
    %21 = arith.addf %18, %20 : vector<16x128xf32>
    %cst_17 = arith.constant 0.000000e+00 : f32
    %22 = vector.broadcast %cst_17 : f32 to vector<16x128xf32>
    %23 = arith.maximumf %21, %22 : vector<16x128xf32>
    %24 = arith.truncf %23 : vector<16x128xf32> to vector<16x128xbf16>
    %c0_18 = arith.constant 0 : index
    %c0_19 = arith.constant 0 : index
    %25 = vector.load %arg8[%c0_18, %c0_19] : memref<128x128xbf16, #tpu.memory_space<vmem>>, vector<128x128xbf16>
    %cst_20 = arith.constant dense<0.000000e+00> : vector<16x128xf32>
    %26 = tpu.matmul %24, %25, %cst_20 {dimension_numbers = #tpu.dot_dimension_numbers<[1], [0], [0], [1], [0, 0, 1, 1], [], []>} : vector<16x128xbf16>, vector<128x128xbf16>, vector<16x128xf32> -> vector<16x128xf32>
    %c0_21 = arith.constant 0 : index
    %c0_22 = arith.constant 0 : index
    %27 = vector.load %arg9[%c0_21, %c0_22] : memref<1x128xf32, #tpu.memory_space<vmem>>, vector<1x128xf32>
    %28 = vector.broadcast %27 : vector<1x128xf32> to vector<16x128xf32>
    %29 = arith.addf %26, %28 : vector<16x128xf32>
    %30 = arith.truncf %29 : vector<16x128xf32> to vector<16x128xbf16>
    %c0_23 = arith.constant 0 : index
    %c0_24 = arith.constant 0 : index
    %31 = vector.load %arg10[%c0_23, %c0_24] : memref<16x128xbf16, #tpu.memory_space<vmem>>, vector<16x128xbf16>
    tpu.vector_store %arg10[%c0_23, %c0_24], %30 {strides = array<i32>} : memref<16x128xbf16, #tpu.memory_space<vmem>>, vector<16x128xbf16>,
    return
  }
  func.func @transform_0(%arg0: i32) -> (i32, i32) {
    %c0_i32 = arith.constant 0 : i32
    %c0_i32_0 = arith.constant 0 : i32
    return %arg0, %c0_i32 : i32, i32
  }
  func.func @transform_1(%arg0: i32) -> (i32, i32) {
    %c0_i32 = arith.constant 0 : i32
    %c0_i32_0 = arith.constant 0 : i32
    %c0_i32_1 = arith.constant 0 : i32
    return %c0_i32, %c0_i32_0 : i32, i32
  }
  func.func @transform_2(%arg0: i32) -> (i32, i32) {
    %c0_i32 = arith.constant 0 : i32
    %c0_i32_0 = arith.constant 0 : i32
    %c0_i32_1 = arith.constant 0 : i32
    return %c0_i32, %c0_i32_0 : i32, i32
  }
  func.func @transform_3(%arg0: i32) -> (i32, i32) {
    %c0_i32 = arith.constant 0 : i32
    %c0_i32_0 = arith.constant 0 : i32
    %c0_i32_1 = arith.constant 0 : i32
    return %c0_i32, %c0_i32_0 : i32, i32
  }
  func.func @transform_4(%arg0: i32) -> (i32, i32) {
    %c0_i32 = arith.constant 0 : i32
    %c0_i32_0 = arith.constant 0 : i32
    %c0_i32_1 = arith.constant 0 : i32
    return %c0_i32, %c0_i32_0 : i32, i32
  }
  func.func @transform_5(%arg0: i32) -> (i32, i32) {
    %c0_i32 = arith.constant 0 : i32
    %c0_i32_0 = arith.constant 0 : i32
    %c0_i32_1 = arith.constant 0 : i32
    return %c0_i32, %c0_i32_0 : i32, i32
  }
  func.func @transform_6(%arg0: i32) -> (i32, i32) {
    %c0_i32 = arith.constant 0 : i32
    %c0_i32_0 = arith.constant 0 : i32
    %c0_i32_1 = arith.constant 0 : i32
    return %c0_i32, %c0_i32_0 : i32, i32
  }
  func.func @transform_7(%arg0: i32) -> (i32, i32) {
    %c0_i32 = arith.constant 0 : i32
    %c0_i32_0 = arith.constant 0 : i32
    %c0_i32_1 = arith.constant 0 : i32
    return %c0_i32, %c0_i32_0 : i32, i32
  }
  func.func @transform_8(%arg0: i32) -> (i32, i32) {
    %c0_i32 = arith.constant 0 : i32
    %c0_i32_0 = arith.constant 0 : i32
    %c0_i32_1 = arith.constant 0 : i32
    return %c0_i32, %c0_i32_0 : i32, i32
  }
  func.func @transform_9(%arg0: i32) -> (i32, i32) {
    %c0_i32 = arith.constant 0 : i32
    %c0_i32_0 = arith.constant 0 : i32
    return %arg0, %c0_i32 : i32, i32
  }
}

</mosaic_0001>

<bundles_post_ra>
// kernel: mlp2_forward.1
= control target key start
LH: loop header
LB: loop body
LE: loop exit
PB: predicated region body
PF: predicated region fallthrough
CT: control target
= control target key end

     0   :  { %14 = vsyncpa [#allocation3], 0  ;;  %s1905_s0 = inlined_call_operand.vmem [shape: bf16[2,784], index: 0, kind: input, shape index: {}]   ;;  %s1906_s1 = inlined_call_operand.hbm [shape: bf16[784,128], index: 1, kind: input, shape index: {}]   ;;  %s1907_s2 = inlined_call_operand.vmem [shape: f32[1,128], index: 2, kind: input, shape index: {}]   ;;  %s1908_s3 = inlined_call_operand.vmem [shape: bf16[128,128], index: 3, kind: input, shape index: {}]   ;;  %s1909_s4 = inlined_call_operand.vmem [shape: f32[1,128], index: 4, kind: input, shape index: {}]   ;;  %s1910_s5 = inlined_call_operand.hbm [shape: bf16[128,128], index: 5, kind: input, shape index: {}]   ;;  %s1911_s6 = inlined_call_operand.vmem [shape: f32[1,128], index: 6, kind: input, shape index: {}]   ;;  %s1912_s7 = inlined_call_operand.hbm [shape: bf16[128,128], index: 7, kind: input, shape index: {}]   ;;  %s1913_s8 = inlined_call_operand.vmem [shape: f32[1,128], index: 8, kind: input, shape index: {}]   ;;  %s1914_s9 = inlined_call_operand.hbm [shape: bf16[2,128], index: 9, kind: output, shape index: {}]  }
   0x1   :  { %15 = vsyncpa [#allocation6], 0 }
   0x2   :  { %16 = vsyncpa [#allocation4], 0  ;;  %s1663_s30 = smov [#allocation5]   ;;  %s1664_s11 = smov [#allocation2]  }
   0x3   :  { %s42_s10 = sshll.u32 %s1663_s30, 4  ;;  %s24_s12 = sshll.u32 %s1664_s11, 4  ;;  %s43_s10 = int_to_ptr.vmem [resolvable:$true] %s42_s10  ;;  %s1724_s12 = int_to_ptr.vmem [resolvable:$true] %s24_s12 }
   0x4   :  { %s1569_s15 = scalar_lea.hbm %s1910_s5, 1024 }
   0x5   :  { %p1570_p0 = scmp.ne.s32.totalorder %s1910_s5, %s1569_s15  ;;  %p1573_p1 = scmp.lt.u32.totalorder %s1569_s15, %s1910_s5 }
   0x7   :  { %p1575_p2 = pnand %p1573_p1, %p1570_p0 }
   0x9   :  { %1578 = shalt.err (!%p1575_p2)
}
   0xa   :  { %s1579_s20 = scalar_lea.vmem %s43_s10, 1024  ;;  %p1584_p4 = scmp.lt.s32.totalorder %s43_s10, %s43_s10 }
   0xb   :  { %p1580_p3 = scmp.ne.s32.totalorder %s43_s10, %s1579_s20  ;;  %p1585_p5 = scmp.lt.s32.totalorder %s1579_s20, %s1579_s20 }
   0xd   :  { %p1586_p6 = por %p1585_p5, %p1584_p4 }
   0xf   :  { %p1587_p7 = pnand %p1586_p6, %p1580_p3 }
  0x11   :  { %1590 = shalt.err (!%p1587_p7)
}
  0x12   :  { %s1665_s21 = smov 64   ;;  %s1666_s22 = smov 4  }
  0x13   :  { %48 = dma.hbm_to_vmem [thread:$0]  %s1910_s5, 1024, %s43_s10, [#allocation6], %s1665_s21, %s1665_s21, %s1666_s22  }
  0x14   :  { %s1591_s27 = scalar_lea.hbm %s1906_s1, 6272 }
  0x15   :  { %p1592_p8 = scmp.ne.s32.totalorder %s1906_s1, %s1591_s27  ;;  %p1595_p9 = scmp.lt.u32.totalorder %s1591_s27, %s1906_s1 }
  0x17   :  { %p1597_p10 = pnand %p1595_p9, %p1592_p8 }
  0x19   :  { %1600 = shalt.err (!%p1597_p10)
}
  0x1a   :  { %s1601_s13 = scalar_lea.vmem %s1724_s12, 6272  ;;  %p1606_p12 = scmp.lt.s32.totalorder %s1724_s12, %s1724_s12 }
  0x1b   :  { %p1602_p11 = scmp.ne.s32.totalorder %s1724_s12, %s1601_s13  ;;  %p1607_p13 = scmp.lt.s32.totalorder %s1601_s13, %s1601_s13 }
  0x1d   :  { %p1608_p0 = por %p1607_p13, %p1606_p12 }
  0x1f   :  { %p1609_p1 = pnand %p1608_p0, %p1602_p11 }
  0x21   :  { %1612 = shalt.err (!%p1609_p1)
}
  0x22   :  { %30 = dma.hbm_to_vmem [thread:$0]  %s1906_s1, 6272, %s1724_s12, [#allocation3], %s1665_s21, %s1665_s21, %s1666_s22  }
  0x23   :  { %s1667_s14 = smov [#allocation7]   ;;  %s1613_s18 = scalar_lea.hbm %s1912_s7, 1024 }
  0x24   :  { %s56_s15 = sshll.u32 %s1667_s14, 4  ;;  %p1614_p2 = scmp.ne.s32.totalorder %s1912_s7, %s1613_s18  ;;  %s57_s15 = int_to_ptr.vmem [resolvable:$true] %s56_s15 }
  0x25   :  { %p1617_p3 = scmp.lt.u32.totalorder %s1613_s18, %s1912_s7 }
  0x27   :  { %p1619_p4 = pnand %p1617_p3, %p1614_p2 }
  0x29   :  { %1622 = shalt.err (!%p1619_p4)
}
  0x2a   :  { %s1623_s25 = scalar_lea.vmem %s57_s15, 1024  ;;  %p1628_p6 = scmp.lt.s32.totalorder %s57_s15, %s57_s15 }
  0x2b   :  { %p1624_p5 = scmp.ne.s32.totalorder %s57_s15, %s1623_s25  ;;  %p1629_p7 = scmp.lt.s32.totalorder %s1623_s25, %s1623_s25 }
  0x2d   :  { %p1630_p8 = por %p1629_p7, %p1628_p6 }
  0x2f   :  { %p1631_p9 = pnand %p1630_p8, %p1624_p5 }
  0x31   :  { %1634 = shalt.err (!%p1631_p9)
}
  0x32   :  { %62 = dma.hbm_to_vmem [thread:$0]  %s1912_s7, 1024, %s57_s15, [#allocation6], %s1665_s21, %s1665_s21, %s1666_s22  }
  0x33   :  { %1657 = dma.done.wait [#allocation3], 6272  }
  0x34   :  { %1658 = vsyncadd [#allocation3], 4294961024 }
  0x35   :  { %1659 = dma.done.wait [#allocation6], 2048  }
  0x36   :  { %1660 = vsyncadd [#allocation6], 4294965248  ;;  %v1484_v0 = vld [vmem:[#allocation2 + $0x40] sm:$0xff]   ;;  %v1488_v4 = vld [vmem:[#allocation2 + $0x48] sm:$0xff]   ;;  %v1668_v24 = vmov 1966171168   ;;  %v207_v26 = vlaneseq }
  0x37   :  { %v1485_v1 = vld [vmem:[#allocation2] sm:$0xff]   ;;  %1312 = vmatprep.subr.bf16.mxu0 %v1484_v0  ;;  %v1489_v5 = vld [vmem:[#allocation2 + $0x8] sm:$0xff]   ;;  %v1492_v8 = vld [vmem:[#allocation2 + $0x50] sm:$0xff]   ;;  %v205_v25 = vunpack.c.l.s4 %v1668_v24  ;;  %v1669_v51 = vmov 0.0   ;;  %vm1670_vm0 = vmmov 0   ;;  %vm631_vm1 = vcmask 130048  }
  0x38   :  { %v1486_v2 = vld [vmem:[#allocation2 + $0xc0] sm:$0xff]   ;;  %1313 = vmatpush3.bf16.msra.mxu0 %v1485_v1  ;;  %v1490_v6 = vld [vmem:[#allocation2 + $0xc8] sm:$0xff]   ;;  %v1493_v9 = vld [vmem:[#allocation2 + $0x10] sm:$0xff]   ;;  %v208_v32 = vshrl.u32 %v207_v26, 7 }
  0x39   :  { %v1487_v3 = vld [vmem:[#allocation2 + $0x80] sm:$0xff]   ;;  %1334 = vmatprep.subr.bf16.mxu1 %v1486_v2  ;;  %1314 = vmatprep.subr.bf16.mxu0 %v1488_v4  ;;  %v1491_v7 = vld [vmem:[#allocation2 + $0x88] sm:$0xff]   ;;  %v1494_v10 = vld [vmem:[#allocation2 + $0xd0] sm:$0xff]   ;;  %v206_v31 = vunpack.c.0.s8 %v205_v25 }
  0x3a   :  { %1335 = vmatpush3.bf16.msra.mxu1 %v1487_v3  ;;  %v1495_v11 = vld [vmem:[#allocation2 + $0x90] sm:$0xff]   ;;  %v1496_v12 = vld [vmem:[#allocation2 + $0x58] sm:$0xff]   ;;  %v1500_v16 = vld [vmem:[#allocation2 + $0x60] sm:$0xff]  }
  0x3b   :  { %1336 = vmatprep.subr.bf16.mxu1 %v1490_v6  ;;  %v1497_v13 = vld [vmem:[#allocation2 + $0x18] sm:$0xff]   ;;  %v1501_v17 = vld [vmem:[#allocation2 + $0x20] sm:$0xff]   ;;  %v1504_v20 = vld [vmem:[#allocation2 + $0x68] sm:$0xff]   ;;  %v1776_v36 = vsub.s32 %v206_v31, %v208_v32 }
  0x3c   :  { %1315 = vmatpush3.bf16.msra.mxu0 %v1489_v5  ;;  %v1498_v14 = vld [vmem:[#allocation2 + $0xd8] sm:$0xff]   ;;  %v1502_v18 = vld [vmem:[#allocation2 + $0xe0] sm:$0xff]   ;;  %v1505_v21 = vld [vmem:[#allocation2 + $0x28] sm:$0xff]  }
  0x3d   :  { %1316 = vmatprep.subr.bf16.mxu0 %v1492_v8  ;;  %v1499_v15 = vld [vmem:[#allocation2 + $0x98] sm:$0xff]   ;;  %v1503_v19 = vld [vmem:[#allocation2 + $0xa0] sm:$0xff]   ;;  %v1506_v22 = vld [vmem:[#allocation2 + $0xe8] sm:$0xff]  }
  0x3e   :  { %1337 = vmatpush3.bf16.msra.mxu1 %v1491_v7  ;;  %v1507_v23 = vld [vmem:[#allocation2 + $0xa8] sm:$0xff]   ;;  %v1508_v27 = vld [vmem:[#allocation2 + $0x70] sm:$0xff]   ;;  %v1512_v33 = vld [vmem:[#allocation2 + $0x78] sm:$0xff]  }
  0x3f   :  { %1338 = vmatprep.subr.bf16.mxu1 %v1494_v10  ;;  %v1509_v28 = vld [vmem:[#allocation2 + $0x30] sm:$0xff]   ;;  %v1513_v34 = vld [vmem:[#allocation2 + $0x38] sm:$0xff]   ;;  %v1515_v37 = vld [vmem:[%s1905_s0] ss:$7 sps:$4 sm:$0xff]  }
  0x40   :  { %1317 = vmatpush3.bf16.msra.mxu0 %v1493_v9  ;;  %v1510_v29 = vld [vmem:[#allocation2 + $0xf0] sm:$0xff]   ;;  %v1514_v35 = vld [vmem:[#allocation2 + $0xf8] sm:$0xff]   ;;  %v1517_v38 = vld [vmem:[%s1905_s0 + $0x4] ss:$7 sps:$4 sm:$0x77]   ;;  %v210_v43 = vrot.slane %v1515_v37, %v1776_v36 }
  0x41   :  { %1318 = vmatprep.subr.bf16.mxu0 %v1496_v12  ;;  %v1511_v30 = vld [vmem:[#allocation2 + $0xb0] sm:$0xff]   ;;  %v1527_v40 = vld [vmem:[#allocation2 + $0xb8] sm:$0xff]   ;;  %v1528_v44 = vld [vmem:[#allocation2 + $0x140] sm:$0xff]   ;;  %v217_v48 = vrot.slane %v1517_v38, %v1776_v36 }
  0x42   :  { %1339 = vmatpush3.bf16.msra.mxu1 %v1495_v11  ;;  %v1518_v39 = vld [vmem:[%s1905_s0 + $0xe] ss:$7 sps:$4 sm:$0xff]   ;;  %v1520_v41 = vld [vmem:[%s1905_s0 + $0x12] ss:$7 sps:$4 sm:$0x77]   ;;  %v1529_v7 = vld [vmem:[#allocation2 + $0x100] sm:$0xff]  }
  0x43   :  { %1340 = vmatprep.subr.bf16.mxu1 %v1498_v14  ;;  %v1521_v42 = vld [vmem:[%s1905_s0 + $0x1c] ss:$7 sps:$4 sm:$0xff]   ;;  %v1523_v45 = vld [vmem:[%s1905_s0 + $0x20] ss:$7 sps:$4 sm:$0x77]   ;;  %v224_v47 = vrot.slane %v1518_v39, %v1776_v36  ;;  %v231_v52 = vrot.slane %v1520_v41, %v1776_v36  ;;  %v1532_v12 = vld [vmem:[#allocation2 + $0x150] sm:$0xff]  }
  0x44   :  { %1319 = vmatpush3.bf16.msra.mxu0 %v1497_v13  ;;  %v1524_v46 = vld [vmem:[%s1905_s0 + $0x2a] ss:$7 sps:$4 sm:$0xff]   ;;  %v1526_v49 = vld [vmem:[%s1905_s0 + $0x2e] ss:$7 sps:$4 sm:$0x77]   ;;  %v238_v50 = vrot.slane %v1521_v42, %v1776_v36  ;;  %v245_v56 = vrot.slane %v1523_v45, %v1776_v36  ;;  %v1545_v31 = vld [vmem:[%s1908_s3] sm:$0xff]  }
  0x45   :  { %1320 = vmatprep.subr.bf16.mxu0 %v1500_v16  ;;  %v252_v53 = vrot.slane %v1524_v46, %v1776_v36  ;;  %v261_v54 = vcombine.high %v210_v43, %v224_v47  ;;  %v260_v55 = vcombine.low %v210_v43, %v224_v47  ;;  %v259_v57 = vrot.slane %v1526_v49, %v1776_v36  ;;  %v1530_v9 = vld [vmem:[#allocation2 + $0x148] sm:$0xff]   ;;  %v1534_v16 = vld [vmem:[#allocation2 + $0x158] sm:$0xff]   ;;  %v1540_v26 = vld [vmem:[#allocation2 + $0x170] sm:$0xff]  }
  0x46   :  { %1341 = vmatpush3.bf16.msra.mxu1 %v1499_v15  ;;  %v263_v58 = vcombine.high %v217_v48, %v231_v52  ;;  %v1531_v11 = vld [vmem:[#allocation2 + $0x108] sm:$0xff]   ;;  %v262_v13 = vcombine.low %v217_v48, %v231_v52  ;;  %v1533_v15 = vld [vmem:[#allocation2 + $0x110] sm:$0xff]   ;;  %v1552_v39 = vld [vmem:[%s1908_s3 + $0x38] sm:$0xff]  }
  0x47   :  { %1342 = vmatprep.subr.bf16.mxu1 %v1502_v18  ;;  %v265_v59 = vcombine.high %v238_v50, %v252_v53  ;;  %v288_v60 = vrot.slane %v261_v54, %v1776_v36  ;;  %v264_v61 = vcombine.low %v238_v50, %v252_v53  ;;  %v274_v62 = vrot.slane %v260_v55, %v1776_v36  ;;  %v1538_v24 = vld [vmem:[#allocation2 + $0x168] sm:$0xff]   ;;  %v1551_v38 = vld [vmem:[%s1908_s3 + $0x30] sm:$0xff]   ;;  %v1555_v42 = vld [vmem:[#allocation5 + $0x10] sm:$0xff]  }
  0x48   :  { %1321 = vmatpush3.bf16.msra.mxu0 %v1501_v17  ;;  %v267_v63 = vcombine.high %v245_v56, %v259_v57  ;;  %v295_v0 = vrot.slane %v263_v58, %v1776_v36  ;;  %v266_v14 = vcombine.low %v245_v56, %v259_v57  ;;  %v281_v17 = vrot.slane %v262_v13, %v1776_v36  ;;  %v1539_v25 = vld [vmem:[#allocation2 + $0x128] sm:$0xff]   ;;  %v1554_v41 = vld [vmem:[#allocation5 + $0x8] sm:$0xff]   ;;  %v1556_v43 = vld [vmem:[#allocation5 + $0x18] sm:$0xff]  }
  0x49   :  { %1322 = vmatprep.subr.bf16.mxu0 %v1504_v20  ;;  %v316_v1 = vrot.slane %v265_v59, %v1776_v36  ;;  %v302_v2 = vrot.slane %v264_v61, %v1776_v36  ;;  %v1544_v20 = vld [vmem:[#allocation2 + $0x180] sm:$0xff]   ;;  %v1546_v32 = vld [vmem:[%s1908_s3 + $0x8] sm:$0xff]   ;;  %v1558_v45 = vld [vmem:[#allocation5 + $0x28] sm:$0xff]  }
  0x4a   :  { %1343 = vmatpush3.bf16.msra.mxu1 %v1503_v19  ;;  %v323_v3 = vrot.slane %v267_v63, %v1776_v36  ;;  %v309_v18 = vrot.slane %v266_v14, %v1776_v36  ;;  %v1535_v19 = vld [vmem:[#allocation2 + $0x118] sm:$0xff]   ;;  %v1550_v37 = vld [vmem:[%s1908_s3 + $0x28] sm:$0xff]   ;;  %v1229_v48 = vld [vmem:[%s1907_s2] ss:$0 sm:$0xff] }
  0x4b   :  { %1344 = vmatprep.subr.bf16.mxu1 %v1506_v22  ;;  %v328_v4 = vcombine.low %v288_v60, %v316_v1  ;;  %v324_v5 = vcombine.low %v274_v62, %v302_v2  ;;  %v329_v6 = vcombine.high %v288_v60, %v316_v1  ;;  %v325_v8 = vcombine.high %v274_v62, %v302_v2 }
  0x4c   :  { %1323 = vmatpush3.bf16.msra.mxu0 %v1505_v21  ;;  %v330_v10 = vcombine.low %v295_v0, %v323_v3  ;;  %v1536_v21 = vld [vmem:[#allocation2 + $0x160] sm:$0xff]   ;;  %v327_v22 = vcombine.high %v281_v17, %v309_v18 }
  0x4d   :  { %1324 = vmatprep.subr.bf16.mxu0 %v1508_v27  ;;  %667 = vmatprep.mubr.bf16.mxu0 %v328_v4  ;;  %v1541_v27 = vld [vmem:[#allocation2 + $0x130] sm:$0xff]  }
  0x4e   :  { %1345 = vmatpush3.bf16.msra.mxu1 %v1507_v23  ;;  %708 = vmatprep.mubr.bf16.mxu1 %v329_v6  ;;  %v1537_v23 = vld [vmem:[#allocation2 + $0x120] sm:$0xff]  }
  0x4f   :  { %1346 = vmatprep.subr.bf16.mxu1 %v1510_v29  ;;  %v1543_v29 = vld [vmem:[#allocation2 + $0x138] sm:$0xff]  }
  0x50   :  { %1325 = vmatpush3.bf16.msra.mxu0 %v1509_v28  ;;  %v1542_v28 = vld [vmem:[#allocation2 + $0x178] sm:$0xff]  }
  0x51   :  { %1326 = vmatprep.subr.bf16.mxu0 %v1512_v33  ;;  %v1547_v33 = vld [vmem:[%s1908_s3 + $0x10] sm:$0xff]  }
  0x52   :  { %1347 = vmatpush3.bf16.msra.mxu1 %v1511_v30  ;;  %v326_v30 = vcombine.low %v281_v17, %v309_v18  ;;  %v1559_v17 = vld [vmem:[#allocation5 + $0x30] sm:$0xff]   ;;  %v1560_v18 = vld [vmem:[#allocation5 + $0x38] sm:$0xff]  }
  0x53   :  { %1348 = vmatprep.subr.bf16.mxu1 %v1514_v35  ;;  %v1549_v35 = vld [vmem:[%s1908_s3 + $0x20] sm:$0xff]  }
  0x54   :  { %1327 = vmatpush3.bf16.msra.mxu0 %v1513_v34  ;;  %v1548_v34 = vld [vmem:[%s1908_s3 + $0x18] sm:$0xff]  }
  0x55   :  { %1356 = vmatprep.subr.bf16.mxu0 %v1528_v44  ;;  %v1557_v44 = vld [vmem:[#allocation5 + $0x20] sm:$0xff]  }
  0x56   :  { %1349 = vmatpush3.bf16.msra.mxu1 %v1527_v40  ;;  %v1553_v40 = vld [vmem:[#allocation5] sm:$0xff]  }
  0x57   :  { %1407 = vmatprep.subr.bf16.mxu1 %v1669_v51  ;;  %668 = vmatmul.mubr.bf16.vlgmr.msra.gmra.mrb[0].mxu0 %v324_v5 }
  0x58   :  { %1357 = vmatpush3.bf16.msra.mxu0 %v1529_v7  ;;  %749 = vmatprep.mubr.bf16.mxu0 %v330_v10 }
  0x59   :  { %709 = vmatmul.mubr.bf16.vlgmr.msra.gmra.mrb[0].mxu1 %v325_v8  ;;  %1358 = vmatprep.subr.bf16.mxu0 %v1530_v9 }
  0x5a   :  { %1409 = vmatprep.mubr.msk.bf16.mxu1 %vm1670_vm0, %v1669_v51  ;;  %1408 = vmatpush3.bf16.msra.mxu1 %v1544_v20  ;;  %v1562_v20 = vld [vmem:[#allocation7 + $0x8] sm:$0xff]  }
  0x5b   :  { %1413 = vmatprep.subr.bf16.mxu1 %v1669_v51 }
  0x5c   :  { %1359 = vmatpush3.bf16.msra.mxu0 %v1531_v11 }
  0x5d   :  { %1360 = vmatprep.subr.bf16.mxu0 %v1532_v12 }
  0x60   :  { %1361 = vmatpush3.bf16.msra.mxu0 %v1533_v15 }
  0x61   :  { %1362 = vmatprep.subr.bf16.mxu0 %v1534_v16  ;;  %1410 = vmatmul.mubr.msk.bf16.vlgmr.msra.gmra.mrb[4].mxu1 %vm631_vm1, %v327_v22  ;;  %v1564_v22 = vld [vmem:[#allocation7 + $0x18] sm:$0xff]  }
  0x62   :  { %1429 = vmatprep.mubr.msk.bf16.mxu1 %vm1670_vm0, %v1669_v51  ;;  %1414 = vmatpush3.bf16.msra.mxu1 %v1545_v31 }
  0x63   :  { %1415 = vmatprep.subr.bf16.mxu1 %v1669_v51 }
  0x64   :  { %1363 = vmatpush3.bf16.msra.mxu0 %v1535_v19  ;;  %v1561_v19 = vld [vmem:[#allocation7] sm:$0xff]  }
  0x65   :  { %1364 = vmatprep.subr.bf16.mxu0 %v1536_v21  ;;  %v1563_v21 = vld [vmem:[#allocation7 + $0x10] sm:$0xff]  }
  0x66   :  { %1416 = vmatpush3.bf16.msra.mxu1 %v1546_v32 }
  0x67   :  { %1417 = vmatprep.subr.bf16.mxu1 %v1669_v51 }
  0x68   :  { %1365 = vmatpush3.bf16.msra.mxu0 %v1537_v23  ;;  %v1565_v23 = vld [vmem:[#allocation7 + $0x20] sm:$0xff]  }
  0x69   :  { %1366 = vmatprep.subr.bf16.mxu0 %v1538_v24  ;;  %v1566_v24 = vld [vmem:[#allocation7 + $0x28] sm:$0xff]  }
  0x6a   :  { %1418 = vmatpush3.bf16.msra.mxu1 %v1547_v33 }
  0x6b   :  { %1419 = vmatprep.subr.bf16.mxu1 %v1669_v51 }
  0x6c   :  { %1367 = vmatpush3.bf16.msra.mxu0 %v1539_v25  ;;  %v1280_v25 = vld [vmem:[%s1909_s4] ss:$0 sm:$0xff] }
  0x6d   :  { %1368 = vmatprep.subr.bf16.mxu0 %v1540_v26 }
  0x6e   :  { %1420 = vmatpush3.bf16.msra.mxu1 %v1548_v34 }
  0x6f   :  { %1421 = vmatprep.subr.bf16.mxu1 %v1669_v51 }
  0x70   :  { %1369 = vmatpush3.bf16.msra.mxu0 %v1541_v27 }
  0x71   :  { %1370 = vmatprep.subr.bf16.mxu0 %v1542_v28 }
  0x72   :  { %1422 = vmatpush3.bf16.msra.mxu1 %v1549_v35  ;;  %v1567_v35 = vld [vmem:[#allocation7 + $0x30] sm:$0xff]  }
  0x73   :  { %1423 = vmatprep.subr.bf16.mxu1 %v1669_v51 }
  0x74   :  { %1371 = vmatpush3.bf16.msra.mxu0 %v1543_v29 }
  0x75   :  { %1433 = vmatprep.subr.bf16.mxu0 %v1669_v51 }
  0x76   :  { %1424 = vmatpush3.bf16.msra.mxu1 %v1550_v37  ;;  %v1568_v37 = vld [vmem:[#allocation7 + $0x38] sm:$0xff]  }
  0x77   :  { %750 = vmatmul.mubr.bf16.vlgmr.msra.gmra.mrb[4].mxu0 %v326_v30  ;;  %1425 = vmatprep.subr.bf16.mxu1 %v1669_v51 }
  0x78   :  { %1449 = vmatprep.mubr.msk.bf16.mxu0 %vm1670_vm0, %v1669_v51  ;;  %1434 = vmatpush3.bf16.msra.mxu0 %v1553_v40 }
  0x79   :  { %1435 = vmatprep.subr.bf16.mxu0 %v1669_v51 }
  0x7a   :  { %1426 = vmatpush3.bf16.msra.mxu1 %v1551_v38  ;;  %v1289_v38 = vld [vmem:[%s1911_s6] ss:$0 sm:$0xff] }
  0x7b   :  { %1427 = vmatprep.subr.bf16.mxu1 %v1669_v51 }
  0x7c   :  { %1436 = vmatpush3.bf16.msra.mxu0 %v1554_v41 }
  0x7d   :  { %1437 = vmatprep.subr.bf16.mxu0 %v1669_v51 }
  0x7e   :  { %1428 = vmatpush3.bf16.msra.mxu1 %v1552_v39 }
  0x7f   :  { %1453 = vmatprep.subr.bf16.mxu1 %v1669_v51 }
  0x80   :  { %1438 = vmatpush3.bf16.msra.mxu0 %v1555_v42 }
  0x81   :  { %1439 = vmatprep.subr.bf16.mxu0 %v1669_v51 }
  0x84   :  { %1440 = vmatpush3.bf16.msra.mxu0 %v1556_v43 }
  0x85   :  { %1441 = vmatprep.subr.bf16.mxu0 %v1669_v51 }
  0x88   :  { %1442 = vmatpush3.bf16.msra.mxu0 %v1557_v44 }
  0x89   :  { %1443 = vmatprep.subr.bf16.mxu0 %v1669_v51 }
  0x8c   :  { %1444 = vmatpush3.bf16.msra.mxu0 %v1558_v45 }
  0x8d   :  { %1445 = vmatprep.subr.bf16.mxu0 %v1669_v51 }
  0x90   :  { %1446 = vmatpush3.bf16.msra.mxu0 %v1559_v17 }
  0x91   :  { %1447 = vmatprep.subr.bf16.mxu0 %v1669_v51 }
  0x94   :  { %1448 = vmatpush3.bf16.msra.mxu0 %v1560_v18 }
 0x12a   :  { %v1328_v46 = vpop.f32.mrb[0].mxu0 }
 0x12b   :  { %v1329_v49 = vpop.f32.mrb[1].mxu0 }
 0x12c   :  { %v1350_v47 = vpop.f32.mrb[0].mxu1  ;;  %v1330_v52 = vadd.f32 %v1329_v49, %v1328_v46  ;;  %v1331_v53 = vpop.f32.mrb[2].mxu0 }
 0x12d   :  { %v1351_v50 = vpop.f32.mrb[1].mxu1  ;;  %v1332_v56 = vpop.f32.mrb[3].mxu0 }
 0x12e   :  { %v1352_v54 = vadd.f32 %v1351_v50, %v1350_v47  ;;  %v1353_v55 = vpop.f32.mrb[2].mxu1  ;;  %v670_v58 = vadd.f32 %v1330_v52, %v1229_v48  ;;  %v1333_v59 = vadd.f32 %v1332_v56, %v1331_v53 }
 0x12f   :  { %v1354_v57 = vpop.f32.mrb[3].mxu1 }
 0x130   :  { %v1355_v60 = vadd.f32 %v1354_v57, %v1353_v55  ;;  %v673_v61 = vadd.f32 %v1333_v59, %v1229_v48  ;;  %v711_v62 = vadd.f32 %v1352_v54, %v670_v58 }
 0x132   :  { %v714_v63 = vadd.f32 %v1355_v60, %v673_v61 }
 0x134   :  { %v792_v0 = vpop.f32.mrb[4].mxu1 }
 0x135   :  { %v1411_v1 = vpop.f32.mrb[5].mxu1 }
 0x136   :  { %v795_v2 = vpop.f32.mrb[6].mxu1 }
 0x137   :  { %v1412_v3 = vpop.f32.mrb[7].mxu1 }
 0x14a   :  { %v1372_v4 = vpop.f32.mrb[4].mxu0 }
 0x14b   :  { %v1373_v5 = vpop.f32.mrb[5].mxu0 }
 0x14c   :  { %v1374_v6 = vadd.f32 %v1373_v5, %v1372_v4  ;;  %v1375_v7 = vpop.f32.mrb[6].mxu0 }
 0x14d   :  { %v1376_v8 = vpop.f32.mrb[7].mxu0 }
 0x14e   :  { %v752_v9 = vadd.f32 %v1374_v6, %v711_v62  ;;  %v1377_v10 = vadd.f32 %v1376_v8, %v1375_v7 }
 0x150   :  { %v793_v11 = vadd.f32 %v792_v0, %v752_v9  ;;  %v755_v12 = vadd.f32 %v1377_v10, %v714_v63 }
 0x152   :  { %v796_v13 = vadd.f32 %v795_v2, %v755_v12  ;;  %v799_v14 = vmax.f32 %v793_v11, 0.0 }
 0x154   :  { %v800_v15 = vmax.f32 %v796_v13, 0.0 }
 0x156   :  { %v801_v16 = vpack.c.bf16 %v800_v15, %v799_v14 }
 0x158   :  { %1430 = vmatmul.mubr.bf16.vlgmr.msra.gmra.mrb[8].mxu1 %v801_v16 }
 0x159   :  { %1469 = vmatprep.mubr.msk.bf16.mxu1 %vm1670_vm0, %v1669_v51  ;;  %1454 = vmatpush3.bf16.msra.mxu1 %v1561_v19 }
 0x15a   :  { %1455 = vmatprep.subr.bf16.mxu1 %v1669_v51 }
 0x15d   :  { %1456 = vmatpush3.bf16.msra.mxu1 %v1562_v20 }
 0x15e   :  { %1457 = vmatprep.subr.bf16.mxu1 %v1669_v51 }
 0x161   :  { %1458 = vmatpush3.bf16.msra.mxu1 %v1563_v21 }
 0x162   :  { %1459 = vmatprep.subr.bf16.mxu1 %v1669_v51 }
 0x165   :  { %1460 = vmatpush3.bf16.msra.mxu1 %v1564_v22 }
 0x166   :  { %1461 = vmatprep.subr.bf16.mxu1 %v1669_v51 }
 0x169   :  { %1462 = vmatpush3.bf16.msra.mxu1 %v1565_v23 }
 0x16a   :  { %1463 = vmatprep.subr.bf16.mxu1 %v1669_v51 }
 0x16d   :  { %1464 = vmatpush3.bf16.msra.mxu1 %v1566_v24 }
 0x16e   :  { %1465 = vmatprep.subr.bf16.mxu1 %v1669_v51 }
 0x171   :  { %1466 = vmatpush3.bf16.msra.mxu1 %v1567_v35 }
 0x172   :  { %1467 = vmatprep.subr.bf16.mxu1 %v1669_v51  ;;  %v1298_v51 = vld [vmem:[%s1913_s8] ss:$0 sm:$0xff] }
 0x175   :  { %1468 = vmatpush3.bf16.msra.mxu1 %v1568_v37 }
 0x22b   :  { %v907_v26 = vpop.f32.mrb[8].mxu1 }
 0x22c   :  { %v908_v27 = vadd.f32 %v1280_v25, %v907_v26  ;;  %v1431_v28 = vpop.f32.mrb[9].mxu1 }
 0x22d   :  { %v910_v29 = vpop.f32.mrb[10].mxu1 }
 0x22e   :  { %v911_v30 = vadd.f32 %v1280_v25, %v910_v29  ;;  %v1432_v31 = vpop.f32.mrb[11].mxu1  ;;  %v914_v32 = vmax.f32 %v908_v27, 0.0 }
 0x230   :  { %v915_v33 = vmax.f32 %v911_v30, 0.0 }
 0x232   :  { %v916_v34 = vpack.c.bf16 %v915_v33, %v914_v32 }
 0x234   :  { %1450 = vmatmul.mubr.bf16.vlgmr.msra.gmra.mrb[8].mxu0 %v916_v34 }
 0x307   :  { %v1022_v39 = vpop.f32.mrb[8].mxu0 }
 0x308   :  { %v1023_v40 = vadd.f32 %v1289_v38, %v1022_v39  ;;  %v1451_v41 = vpop.f32.mrb[9].mxu0 }
 0x309   :  { %v1025_v42 = vpop.f32.mrb[10].mxu0 }
 0x30a   :  { %v1026_v43 = vadd.f32 %v1289_v38, %v1025_v42  ;;  %v1452_v44 = vpop.f32.mrb[11].mxu0  ;;  %v1029_v45 = vmax.f32 %v1023_v40, 0.0 }
 0x30c   :  { %v1030_v46 = vmax.f32 %v1026_v43, 0.0 }
 0x30e   :  { %v1031_v47 = vpack.c.bf16 %v1030_v46, %v1029_v45 }
 0x310   :  { %1470 = vmatmul.mubr.bf16.vlgmr.msra.gmra.mrb[12].mxu1 %v1031_v47 }
 0x3e3   :  { %v1137_v48 = vpop.f32.mrb[12].mxu1 }
 0x3e4   :  { %v1471_v49 = vpop.f32.mrb[13].mxu1  ;;  %v1138_v52 = vadd.f32 %v1298_v51, %v1137_v48 }
 0x3e5   :  { %v1140_v50 = vpop.f32.mrb[14].mxu1 }
 0x3e6   :  { %v1141_v53 = vadd.f32 %v1298_v51, %v1140_v50  ;;  %v1472_v54 = vpop.f32.mrb[15].mxu1 }
 0x3e8   :  { %v1144_v55 = vpack.c.bf16 %v1141_v53, %v1138_v52  ;;  %v1307_v56 = vpack.c.bf16 %v1141_v53, %v1141_v53 }
 0x3ea   :  { %v1153_v57 = vrot.slane %v1144_v55, %v1776_v36  ;;  %v1160_v58 = vrot.slane %v1307_v56, %v1776_v36 }
 0x3ec   :  { %v1161_v59 = vcombine.high %v1153_v57, %v1153_v57  ;;  %v1162_v60 = vcombine.high %v1160_v58, %v1160_v58  ;;  %v1169_v61 = vrot.slane %v1153_v57, %v1776_v36  ;;  %v1176_v62 = vrot.slane %v1160_v58, %v1776_v36  ;;  %1308 = vst.sshfl [vmem:[#allocation8] sm:$0x1 pattern:$0x73625140] %v1153_v57 }
 0x3ed   :  { %1310 = vst.sshfl [vmem:[#allocation8 + $0x4] sm:$0x1 pattern:$0x73625140] %v1160_v58 }
 0x3ee   :  { %v1183_v63 = vrot.slane %v1161_v59, %v1776_v36  ;;  %v1190_v0 = vrot.slane %v1162_v60, %v1776_v36  ;;  %v1191_v1 = vcombine.high %v1169_v61, %v1169_v61  ;;  %v1192_v2 = vcombine.high %v1176_v62, %v1176_v62  ;;  %1309 = vst.sshfl [vmem:[#allocation8 + $0x1] sm:$0x1 pattern:$0x73625140] %v1161_v59 }
 0x3ef   :  { %1311 = vst.sshfl [vmem:[#allocation8 + $0x5] sm:$0x1 pattern:$0x73625140] %v1162_v60 }
 0x3f0   :  { %v1193_v3 = vcombine.high %v1183_v63, %v1183_v63  ;;  %v1194_v4 = vcombine.high %v1190_v0, %v1190_v0  ;;  %1205 = vst [vmem:[#allocation8 + $0x2] sm:$0x1] %v1191_v1  ;;  %1209 = vst [vmem:[#allocation8 + $0x6] sm:$0x1] %v1192_v2 }
 0x3f2   :  { %1206 = vst [vmem:[#allocation8 + $0x3] sm:$0x1] %v1193_v3  ;;  %1210 = vst [vmem:[#allocation8 + $0x7] sm:$0x1] %v1194_v4 }
 0x3f3   :  { %1215 = vsyncadd [#allocation4], 112  ;;  %s1671_s6 = smov [#allocation8]  }
 0x3f4   :  { %s1216_s8 = sshll.u32 %s1671_s6, 4  ;;  %s1217_s8 = int_to_ptr.vmem [resolvable:$true] %s1216_s8 }
 0x3f5   :  { %s1635_s14 = scalar_lea.vmem %s1217_s8, 16  ;;  %s1639_s15 = scalar_lea.vmem %s1217_s8, 128 }
 0x3f6   :  { %p1636_p10 = scmp.ne.s32.totalorder %s1217_s8, %s1635_s14  ;;  %p1640_p11 = scmp.lt.s32.totalorder %s1217_s8, %s1217_s8 }
 0x3f7   :  { %p1641_p12 = scmp.lt.s32.totalorder %s1639_s15, %s1635_s14 }
 0x3f9   :  { %p1642_p13 = por %p1641_p12, %p1640_p11 }
 0x3fb   :  { %p1643_p0 = pnand %p1642_p13, %p1636_p10 }
 0x3fd   :  { %1646 = shalt.err (!%p1643_p0)
}
 0x3fe   :  { %s1647_s0 = scalar_lea.hbm %s1914_s9, 16 }
 0x3ff   :  { %p1648_p1 = scmp.ne.s32.totalorder %s1914_s9, %s1647_s0  ;;  %p1651_p2 = scmp.lt.u32.totalorder %s1647_s0, %s1914_s9 }
 0x401   :  { %p1653_p3 = pnand %p1651_p2, %p1648_p1 }
 0x403   :  { %1656 = shalt.err (!%p1653_p3)
}
 0x404   :  { %s1672_s24 = smov 16   ;;  %s1673_s25 = smov 1  }
 0x405   :  { %1222 = dma.vmem_to_hbm [thread:$0]  %s1217_s8, 16, %s1914_s9, [#allocation4], %s1672_s24, %s1672_s24, %s1673_s25  }
 0x406   :  { %1661 = dma.done.wait [#allocation4], 128  }
 0x407   :  { %1662 = vsyncadd [#allocation4], 4294967168 }
 0x408   :  { %1226 = vsyncpa [#allocation3], 1 }
 0x409   :  { %1227 = vsyncpa [#allocation6], 1 }
 0x40a   :  { %1228 = vsyncpa [#allocation4], 1 }

</bundles_post_ra>
